<compile_context>
chip_gen: v5e
topology: v5e:2x2
jax: 0.10.0
libtpu: 0.0.40
codegen_flags: <defaults>
</compile_context>

<pallas_src>
import functools

import jax
import jax.numpy as jnp
from jax.experimental import pallas as pl
from jax.experimental.pallas import tpu as pltpu

_TARGET_TILE_ELEMS = 1024 * 1024        # ~4 MiB f32 per input tile
_VMEM_LIMIT_BYTES = 32 * 1024 * 1024    # safe on v5e/v6e (128 MiB) and v7x (64 MiB)


def _pick_lane(n):
    """Widest lane-dense column width that divides n (avoids any padding)."""
    for lane in (1024, 512, 256, 128):
        if n % lane == 0:
            return lane
    return 128  # fallback: small tail pad, masked in-kernel


def _num_partitions():
    """Leading 'parallel' partitions: 2 on dual-TensorCore v7x, 1 elsewhere."""
    try:
        dev = jax.devices()[0]
        if getattr(dev, "platform", "") != "tpu":
            return 1
        kind = (getattr(dev, "device_kind", "") or "").lower()
        if "v7" in kind:
            return 2
    except Exception:
        pass
    return 1


def _loss_elements(x, t, alpha, gamma, pos_weight):
    """Elementwise focal loss on f32 tiles (matches the PyTorch forward).

    NOTE: like the PyTorch module, pt uses the exact-equality `t == 1`
    select; soft / label-smoothed targets fall into the `1 - probas` branch
    exactly as torch.where(target == 1, ...) would.
    """
    # Stable softplus(-x) built from e = exp(-|x|).
    e = jnp.exp(-jnp.abs(x))
    softplus_neg_x = jnp.maximum(-x, 0.0) + jnp.log1p(e)

    # binary_cross_entropy_with_logits(x, t, reduction='none', pos_weight=pw)
    #   = (1 - t) * x + (1 + (pw - 1) * t) * softplus(-x)
    if pos_weight == 1.0:
        bce = (1.0 - t) * x + softplus_neg_x
    else:
        bce = (1.0 - t) * x + (1.0 + (pos_weight - 1.0) * t) * softplus_neg_x

    # 1 - pt = where(t == 1, 1 - sigmoid(x), sigmoid(x))
    #        = where(t == 1, sigmoid(-x),    sigmoid(x))
    #        = exp(-softplus(where(t == 1, x, -x)))
    # and softplus(x) = x + softplus(-x), so one extra EUP exp replaces the
    # explicit sigmoid's f32 divide + sign select on the saturated VALU slot.
    # (pl.reciprocal(..., approx=True) was considered but this form is both
    #  cheaper and exact to within a few ULPs.)
    one_minus_pt = jnp.exp(-(softplus_neg_x + jnp.where(t == 1.0, x, 0.0)))

    if gamma == 2.0:
        focal = one_minus_pt * one_minus_pt      # avoid pow -> exp(log(.))
    elif gamma == 1.0:
        focal = one_minus_pt
    elif gamma == 0.0:
        focal = jnp.ones_like(one_minus_pt)
    else:
        focal = one_minus_pt ** gamma
    return alpha * focal * bce


def _focal_loss_sum_kernel(x_ref, t_ref, out_ref, *,
                           alpha, gamma, pos_weight,
                           num_row_blocks, mask_tail, tail_valid, lane):
    """Per-partition partial sums folded into the resident (8, lane) output."""
    p = pl.program_id(0)
    s = pl.program_id(1)
    num_s = pl.num_programs(1)
    blk = p * num_s + s                      # global row block handled this step

    @pl.when(s == 0)
    def _():
        out_ref[...] = jnp.zeros_like(out_ref)

    @pl.when(blk < num_row_blocks)           # skip clamped/duplicate edge steps
    def _():
        x = x_ref[...].astype(jnp.float32)
        t = t_ref[...].astype(jnp.float32)
        loss = _loss_elements(x, t, alpha, gamma, pos_weight)

        def fold(vals):
            # (block_rows, lane) -> (block_rows//8, 8, lane) keeps the minor
            # (8, lane) dims tile-aligned (layout-free reshape); the axis-0
            # sum is ~1 VALU add per element into the tiny (8, lane) block.
            out_ref[...] += jnp.sum(vals.reshape(-1, 8, lane), axis=0)

        if mask_tail:
            # Only the very last row block can contain padded / out-of-range
            # elements; mask the WHOLE loss expression there and nowhere else.
            @pl.when(blk == num_row_blocks - 1)
            def _():
                rows = jax.lax.broadcasted_iota(jnp.int32, loss.shape, 0)
                cols = jax.lax.broadcasted_iota(jnp.int32, loss.shape, 1)
                valid = (rows * lane + cols) < tail_valid
                fold(jnp.where(valid, loss, 0.0))

            @pl.when(blk != num_row_blocks - 1)
            def _():
                fold(loss)
        else:
            fold(loss)


def _focal_loss_map_kernel(x_ref, t_ref, o_ref, *, alpha, gamma, pos_weight):
    """Elementwise loss map (reduction='none')."""
    x = x_ref[...].astype(jnp.float32)
    t = t_ref[...].astype(jnp.float32)
    o_ref[...] = _loss_elements(x, t, alpha, gamma, pos_weight).astype(o_ref.dtype)


def _prepare_slab(logits, target):
    """Flatten to a lane-dense (rows, lane) slab.

    Physical padding only happens when the flat length is not a multiple of
    `lane` (fallback lane=128) or the slab has fewer than 8 rows (tiny inputs);
    the common large case is a zero-copy reshape.
    """
    x = logits.reshape(-1)
    t = target.reshape(-1)
    n = int(x.shape[0])

    lane = _pick_lane(n)
    rows = -(-n // lane)
    rows = max(rows, 8)                      # so block_rows can be a multiple of 8
    pad = rows * lane - n
    if pad:
        x = jnp.pad(x, (0, pad))
        t = jnp.pad(t, (0, pad))

    cap = max(8, _TARGET_TILE_ELEMS // lane)      # multiple of 8 for all lanes
    block_rows = min(cap, (rows // 8) * 8)        # multiple of 8, <= rows
    num_row_blocks = -(-rows // block_rows)

    return (x.reshape(rows, lane), t.reshape(rows, lane),
            n, rows, lane, block_rows, num_row_blocks)


def focal_loss(logits, target, *, alpha=0.25, gamma=2.0, reduction='mean',
               pos_weight=None):
    """JAX/Pallas equivalent of FocalLoss.forward(input, target)."""
    pw = 1.0 if pos_weight is None else float(pos_weight)
    x2, t2, n, rows, lane, block_rows, num_row_blocks = _prepare_slab(logits, target)

    if reduction not in ('mean', 'sum'):
        # reduction='none' (the PyTorch `else` branch): unreduced loss map,
        # emitted in the input dtype (bf16 in -> bf16 out halves the writes).
        loss2 = pl.pallas_call(
            functools.partial(_focal_loss_map_kernel, alpha=float(alpha),
                              gamma=float(gamma), pos_weight=pw),
            out_shape=jax.ShapeDtypeStruct((rows, lane), logits.dtype),
            grid_spec=pltpu.PrefetchScalarGridSpec(
                num_scalar_prefetch=0,
                grid=(num_row_blocks,),
                in_specs=[pl.BlockSpec((block_rows, lane), lambda i: (i, 0)),
                          pl.BlockSpec((block_rows, lane), lambda i: (i, 0))],
                out_specs=pl.BlockSpec((block_rows, lane), lambda i: (i, 0)),
            ),
            compiler_params=pltpu.CompilerParams(
                dimension_semantics=("parallel",),
                vmem_limit_bytes=_VMEM_LIMIT_BYTES),
        )(x2, t2)
        return loss2.reshape(-1)[:n].reshape(logits.shape)

    # Sum / mean: blocked reduction folded into the resident (8, lane) output.
    mask_tail = (num_row_blocks * block_rows * lane) != n
    tail_valid = n - (num_row_blocks - 1) * block_rows * lane

    P = max(1, min(_num_partitions(), num_row_blocks))
    S = -(-num_row_blocks // P)              # row blocks per partition

    def row_block_map(p, s):
        # Clamp so edge steps of the last partition never DMA out of range;
        # the kernel skips their accumulation via `blk < num_row_blocks`.
        # With P == 1 (v5e/v6e) the clamp is a no-op and no block is re-read.
        return (jnp.minimum(p * S + s, num_row_blocks - 1), 0)

    in_spec = pl.BlockSpec((block_rows, lane), row_block_map)

    kernel = functools.partial(
        _focal_loss_sum_kernel,
        alpha=float(alpha), gamma=float(gamma), pos_weight=pw,
        num_row_blocks=int(num_row_blocks),
        mask_tail=bool(mask_tail), tail_valid=int(tail_valid), lane=int(lane))

    # TODO(synk): on v7x, verify with a profile that the leading P axis is
    # actually sharded across both TensorCores; if one TC idles, switch the
    # leading axis to pltpu.CORE_PARALLEL (grid size == core count).
    partials = pl.pallas_call(
        kernel,
        out_shape=jax.ShapeDtypeStruct((P * 8, lane), jnp.float32),
        grid_spec=pltpu.PrefetchScalarGridSpec(
            num_scalar_prefetch=0,
            grid=(P, S),
            in_specs=[in_spec, in_spec],
            out_specs=pl.BlockSpec((8, lane), lambda p, s: (p, 0)),
        ),
        compiler_params=pltpu.CompilerParams(
            dimension_semantics=("parallel", "arbitrary"),
            vmem_limit_bytes=_VMEM_LIMIT_BYTES),
    )(x2, t2)

    total = jnp.sum(partials)                # tiny (P*8, lane) epilogue reduce
    if reduction == 'mean':
        return total / jnp.float32(n)
    return total  # 'sum'


def _focal_loss_ref(logits, target, alpha=0.25, gamma=2.0, reduction='mean',
                    pos_weight=None):
    """Pure-JAX reference mirroring the PyTorch forward."""
    x = logits.astype(jnp.float32)
    t = target.astype(jnp.float32)
    pw = 1.0 if pos_weight is None else float(pos_weight)
    sp_neg_x = jnp.maximum(-x, 0.0) + jnp.log1p(jnp.exp(-jnp.abs(x)))
    bce = (1.0 - t) * x + (1.0 + (pw - 1.0) * t) * sp_neg_x
    probas = jax.nn.sigmoid(x)
    pt = jnp.where(t == 1.0, probas, 1.0 - probas)
    loss = alpha * ((1.0 - pt) ** gamma) * bce
    if reduction == 'mean':
        return loss.mean()
    if reduction == 'sum':
        return loss.sum()
    return loss


if __name__ == "__main__":
    key = jax.random.PRNGKey(0)
    k1, k2, k3, k4 = jax.random.split(key, 4)

    # Segmentation-style NCHW logit map.
    N, C, H, W = 2, 4, 16, 16
    logits = jax.random.normal(k1, (N, C, H, W), dtype=jnp.float32) * 2.0
    target = (jax.random.uniform(k2, (N, C, H, W)) > 0.5).astype(jnp.float32)

    out_mean = jax.block_until_ready(
        focal_loss(logits, target, alpha=0.25, gamma=2.0, reduction='mean'))
    ref_mean = _focal_loss_ref(logits, target, alpha=0.25, gamma=2.0)
    assert jnp.allclose(out_mean, ref_mean, rtol=1e-4, atol=1e-6), (out_mean, ref_mean)

    # Ragged size exercising the in-kernel tail mask, pos_weight and 'sum'.
    N2, C2, H2, W2 = 2, 3, 15, 17
    logits2 = jax.random.normal(k3, (N2, C2, H2, W2), dtype=jnp.float32) * 3.0
    target2 = (jax.random.uniform(k4, (N2, C2, H2, W2)) > 0.7).astype(jnp.float32)

    out_sum = jax.block_until_ready(
        focal_loss(logits2, target2, alpha=0.5, gamma=2.0, reduction='sum',
                   pos_weight=2.0))
    ref_sum = _focal_loss_ref(logits2, target2, alpha=0.5, gamma=2.0,
                              reduction='sum', pos_weight=2.0)
    assert jnp.allclose(out_sum, ref_sum, rtol=1e-4, atol=1e-5), (out_sum, ref_sum)

    # reduction='none' (per-element loss map, emitted in the input dtype).
    out_map = jax.block_until_ready(focal_loss(logits, target, reduction='none'))
    ref_map = _focal_loss_ref(logits, target, reduction='none')
    assert out_map.shape == logits.shape and out_map.dtype == logits.dtype
    assert jnp.allclose(out_map, ref_map, rtol=1e-4, atol=1e-5), "loss map mismatch"

    # bf16 inputs stream half the HBM bytes; compute stays f32 in VMEM.
    out_bf16 = jax.block_until_ready(
        focal_loss(logits.astype(jnp.bfloat16), target.astype(jnp.bfloat16)))
    ref_bf16 = _focal_loss_ref(logits.astype(jnp.bfloat16),
                               target.astype(jnp.bfloat16))
    assert jnp.allclose(out_bf16, ref_bf16, rtol=1e-3, atol=1e-5), (out_bf16, ref_bf16)

    print("KERNEL_OK")
</pallas_src>

<mosaic_0001>
module attributes {stable_mosaic.version = 11 : i64} {
  func.func @_focal_loss_sum_kernel(%arg0: i32, %arg1: i32, %arg2: memref<8x1024xf32, #tpu.memory_space<vmem>>, %arg3: memref<8x1024xf32, #tpu.memory_space<vmem>>, %arg4: memref<8x1024xf32, #tpu.memory_space<vmem>>) attributes {dimension_semantics = [#tpu.dimension_semantics<parallel>, #tpu.dimension_semantics<arbitrary>], iteration_bounds = array<i64: 1, 1>, scalar_prefetch = 0 : i64, scratch_operands = 0 : i64, tpu.core_type = #tpu.core_type<tc>, window_params = [{transform_indices = @transform_0, window_bounds = array<i64: 8, 1024>}, {transform_indices = @transform_1, window_bounds = array<i64: 8, 1024>}, {transform_indices = @transform_2, window_bounds = array<i64: 8, 1024>}]} {
    %c1_i32 = arith.constant 1 : i32
    %0 = arith.muli %arg0, %c1_i32 : i32
    %1 = arith.addi %0, %arg1 : i32
    %c0_i32 = arith.constant 0 : i32
    %2 = arith.cmpi eq, %arg1, %c0_i32 : i32
    %3 = arith.extui %2 : i1 to i32
    %c0_i32_0 = arith.constant 0 : i32
    %4 = arith.cmpi ne, %3, %c0_i32_0 : i32
    scf.if %4 {
      %cst = arith.constant 0.000000e+00 : f32
      %8 = vector.broadcast %cst : f32 to vector<8x1024xf32>
      %c0 = arith.constant 0 : index
      %c0_3 = arith.constant 0 : index
      %9 = vector.load %arg4[%c0, %c0_3] : memref<8x1024xf32, #tpu.memory_space<vmem>>, vector<8x1024xf32>
      tpu.vector_store %arg4[%c0, %c0_3], %8 {strides = array<i32>} : memref<8x1024xf32, #tpu.memory_space<vmem>>, vector<8x1024xf32>,
    } else {
    }
    %c1_i32_1 = arith.constant 1 : i32
    %5 = arith.cmpi slt, %1, %c1_i32_1 : i32
    %6 = arith.extui %5 : i1 to i32
    %c0_i32_2 = arith.constant 0 : i32
    %7 = arith.cmpi ne, %6, %c0_i32_2 : i32
    scf.if %7 {
      %c0 = arith.constant 0 : index
      %c0_3 = arith.constant 0 : index
      %8 = vector.load %arg2[%c0, %c0_3] : memref<8x1024xf32, #tpu.memory_space<vmem>>, vector<8x1024xf32>
      %c0_4 = arith.constant 0 : index
      %c0_5 = arith.constant 0 : index
      %9 = vector.load %arg3[%c0_4, %c0_5] : memref<8x1024xf32, #tpu.memory_space<vmem>>, vector<8x1024xf32>
      %10 = math.absf %8 : vector<8x1024xf32>
      %cst = arith.constant 0.000000e+00 : f32
      %11 = vector.broadcast %cst : f32 to vector<8x1024xf32>
      %12 = arith.subf %11, %10 : vector<8x1024xf32>
      %13 = math.exp %12 : vector<8x1024xf32>
      %cst_6 = arith.constant 0.000000e+00 : f32
      %14 = vector.broadcast %cst_6 : f32 to vector<8x1024xf32>
      %15 = arith.subf %14, %8 : vector<8x1024xf32>
      %cst_7 = arith.constant 0.000000e+00 : f32
      %16 = vector.broadcast %cst_7 : f32 to vector<8x1024xf32>
      %17 = arith.maximumf %15, %16 : vector<8x1024xf32>
      %18 = math.log1p %13 : vector<8x1024xf32>
      %19 = arith.addf %17, %18 : vector<8x1024xf32>
      %cst_8 = arith.constant 1.000000e+00 : f32
      %20 = vector.broadcast %cst_8 : f32 to vector<8x1024xf32>
      %21 = arith.subf %20, %9 : vector<8x1024xf32>
      %22 = arith.mulf %21, %8 : vector<8x1024xf32>
      %23 = arith.addf %22, %19 : vector<8x1024xf32>
      %cst_9 = arith.constant 1.000000e+00 : f32
      %24 = vector.broadcast %cst_9 : f32 to vector<8x1024xf32>
      %25 = arith.cmpf oeq, %9, %24 : vector<8x1024xf32>
      %cst_10 = arith.constant 0.000000e+00 : f32
      %26 = vector.broadcast %cst_10 : f32 to vector<8x1024xf32>
      %27 = arith.select %25, %8, %26 : vector<8x1024xi1>, vector<8x1024xf32>
      %28 = arith.addf %19, %27 : vector<8x1024xf32>
      %cst_11 = arith.constant 0.000000e+00 : f32
      %29 = vector.broadcast %cst_11 : f32 to vector<8x1024xf32>
      %30 = arith.subf %29, %28 : vector<8x1024xf32>
      %31 = math.exp %30 : vector<8x1024xf32>
      %32 = arith.mulf %31, %31 : vector<8x1024xf32>
      %cst_12 = arith.constant 2.500000e-01 : f32
      %33 = vector.broadcast %cst_12 : f32 to vector<8x1024xf32>
      %34 = arith.mulf %33, %32 : vector<8x1024xf32>
      %35 = arith.mulf %34, %23 : vector<8x1024xf32>
      %c0_i32_13 = arith.constant 0 : i32
      %36 = arith.cmpi eq, %1, %c0_i32_13 : i32
      %37 = arith.extui %36 : i1 to i32
      %c0_i32_14 = arith.constant 0 : i32
      %38 = arith.cmpi ne, %37, %c0_i32_14 : i32
      scf.if %38 {
        %42 = tpu.iota {dimensions = array<i32: 0>} : vector<8x1024xi32>
        %43 = tpu.iota {dimensions = array<i32: 1>} : vector<8x1024xi32>
        %c1024_i32 = arith.constant 1024 : i32
        %44 = vector.broadcast %c1024_i32 : i32 to vector<8x1024xi32>
        %45 = arith.muli %42, %44 : vector<8x1024xi32>
        %46 = arith.addi %45, %43 : vector<8x1024xi32>
        %c2048_i32 = arith.constant 2048 : i32
        %47 = vector.broadcast %c2048_i32 : i32 to vector<8x1024xi32>
        %48 = arith.cmpi slt, %46, %47 : vector<8x1024xi32>
        %cst_17 = arith.constant 0.000000e+00 : f32
        %49 = vector.broadcast %cst_17 : f32 to vector<8x1024xf32>
        %50 = arith.select %48, %35, %49 : vector<8x1024xi1>, vector<8x1024xf32>
        %c0_18 = arith.constant 0 : index
        %c0_19 = arith.constant 0 : index
        %51 = vector.load %arg4[%c0_18, %c0_19] : memref<8x1024xf32, #tpu.memory_space<vmem>>, vector<8x1024xf32>
        %52 = vector.shape_cast %50 : vector<8x1024xf32> to vector<1x8x1024xf32>
        %cst_20 = arith.constant dense<0.000000e+00> : vector<8x1024xf32>
        %53 = vector.multi_reduction <add>, %52, %cst_20 [0] : vector<1x8x1024xf32> to vector<8x1024xf32>
        %54 = arith.addf %51, %53 : vector<8x1024xf32>
        %c0_21 = arith.constant 0 : index
        %c0_22 = arith.constant 0 : index
        %55 = vector.load %arg4[%c0_21, %c0_22] : memref<8x1024xf32, #tpu.memory_space<vmem>>, vector<8x1024xf32>
        tpu.vector_store %arg4[%c0_21, %c0_22], %54 {strides = array<i32>} : memref<8x1024xf32, #tpu.memory_space<vmem>>, vector<8x1024xf32>,
      } else {
      }
      %c0_i32_15 = arith.constant 0 : i32
      %39 = arith.cmpi ne, %1, %c0_i32_15 : i32
      %40 = arith.extui %39 : i1 to i32
      %c0_i32_16 = arith.constant 0 : i32
      %41 = arith.cmpi ne, %40, %c0_i32_16 : i32
      scf.if %41 {
        %c0_17 = arith.constant 0 : index
        %c0_18 = arith.constant 0 : index
        %42 = vector.load %arg4[%c0_17, %c0_18] : memref<8x1024xf32, #tpu.memory_space<vmem>>, vector<8x1024xf32>
        %43 = vector.shape_cast %35 : vector<8x1024xf32> to vector<1x8x1024xf32>
        %cst_19 = arith.constant dense<0.000000e+00> : vector<8x1024xf32>
        %44 = vector.multi_reduction <add>, %43, %cst_19 [0] : vector<1x8x1024xf32> to vector<8x1024xf32>
        %45 = arith.addf %42, %44 : vector<8x1024xf32>
        %c0_20 = arith.constant 0 : index
        %c0_21 = arith.constant 0 : index
        %46 = vector.load %arg4[%c0_20, %c0_21] : memref<8x1024xf32, #tpu.memory_space<vmem>>, vector<8x1024xf32>
        tpu.vector_store %arg4[%c0_20, %c0_21], %45 {strides = array<i32>} : memref<8x1024xf32, #tpu.memory_space<vmem>>, vector<8x1024xf32>,
      } else {
      }
    } else {
    }
    return
  }
  func.func @transform_0(%arg0: i32, %arg1: i32) -> (i32, i32) {
    %c1_i32 = arith.constant 1 : i32
    %0 = arith.muli %arg0, %c1_i32 : i32
    %1 = arith.addi %0, %arg1 : i32
    %c0_i32 = arith.constant 0 : i32
    %2 = arith.minsi %1, %c0_i32 : i32
    %c0_i32_0 = arith.constant 0 : i32
    %c0_i32_1 = arith.constant 0 : i32
    return %2, %c0_i32_0 : i32, i32
  }
  func.func @transform_1(%arg0: i32, %arg1: i32) -> (i32, i32) {
    %c1_i32 = arith.constant 1 : i32
    %0 = arith.muli %arg0, %c1_i32 : i32
    %1 = arith.addi %0, %arg1 : i32
    %c0_i32 = arith.constant 0 : i32
    %2 = arith.minsi %1, %c0_i32 : i32
    %c0_i32_0 = arith.constant 0 : i32
    %c0_i32_1 = arith.constant 0 : i32
    return %2, %c0_i32_0 : i32, i32
  }
  func.func @transform_2(%arg0: i32, %arg1: i32) -> (i32, i32) {
    %c0_i32 = arith.constant 0 : i32
    %c0_i32_0 = arith.constant 0 : i32
    return %arg0, %c0_i32 : i32, i32
  }
}

</mosaic_0001>

<bundles_post_ra>
// kernel: tpu_custom_call.1
= control target key start
LH: loop header
LB: loop body
LE: loop exit
PB: predicated region body
PF: predicated region fallthrough
CT: control target
= control target key end

     0   :  { %7 = vsyncpa [#allocation3], 0  ;;  %s783_s0 = inlined_call_operand.hbm [shape: f32[8,1024], index: 0, kind: input, shape index: {}]   ;;  %s784_s1 = inlined_call_operand.hbm [shape: f32[8,1024], index: 1, kind: input, shape index: {}]   ;;  %s785_s2 = inlined_call_operand.hbm [shape: f32[8,1024], index: 2, kind: output, shape index: {}]  }
   0x1   :  { %8 = vsyncpa [#allocation6], 0 }
   0x2   :  { %9 = vsyncpa [#allocation4], 0  ;;  %s21_s11 = sshll.u32 %s783_s0, 4  ;;  %s575_s12 = smov [#allocation2]   ;;  %s22_s11 = int_to_ptr.hbm [resolvable:$true] %s21_s11 }
   0x3   :  { %s23_s13 = sshll.u32 %s575_s12, 4  ;;  %s38_s16 = sshll.u32 %s784_s1, 4  ;;  %s24_s13 = int_to_ptr.vmem [resolvable:$true] %s23_s13  ;;  %s39_s16 = int_to_ptr.hbm [resolvable:$true] %s38_s16 }
   0x4   :  { %26 = dma.hbm_to_vmem [thread:$0]  %s22_s11, 1024, %s24_s13, [#allocation3]  }
   0x5   :  { %s576_s17 = smov [#allocation5]  }
   0x6   :  { %s40_s18 = sshll.u32 %s576_s17, 4  ;;  %s41_s18 = int_to_ptr.vmem [resolvable:$true] %s40_s18 }
   0x7   :  { %43 = dma.hbm_to_vmem [thread:$0]  %s39_s16, 1024, %s41_s18, [#allocation6]  }
   0x8   :  { %569 = dma.done.wait [#allocation3], 1024  }
   0x9   :  { %570 = vsyncadd [#allocation3], 4294966272 }
   0xa   :  { %571 = dma.done.wait [#allocation6], 1024  }
   0xb   :  { %572 = vsyncadd [#allocation6], 4294966272  ;;  %v75_v0 = vld [vmem:[#allocation2] sm:$0xff]  ;;  %v599_v1 = vld [vmem:[#allocation2 + $0x8] sm:$0xff]  ;;  %v319_v24 = vlaneseq  ;;  %s577_s0 = smov [#allocation7]   ;;  %s430_s21 = sshll.u32 %s785_s2, 4  ;;  %s431_s21 = int_to_ptr.hbm [resolvable:$true] %s430_s21 }
   0xc   :  { %v91_v2 = vand.u32 2147483647, %v75_v0  ;;  %v92_v3 = vand.u32 2147483647, %v599_v1  ;;  %v602_v4 = vld [vmem:[#allocation2 + $0x10] sm:$0xff]  ;;  %v604_v6 = vld [vmem:[#allocation2 + $0x18] sm:$0xff] }
   0xd   :  { %v93_v8 = vand.u32 2147483647, %v602_v4  ;;  %v94_v10 = vand.u32 2147483647, %v604_v6  ;;  %v83_v13 = vld [vmem:[#allocation5] sm:$0xff]  ;;  %v123_v15 = vsub.f32 0.0, %v75_v0 }
   0xe   :  { %v99_v5 = vsub.f32 0.0, %v91_v2  ;;  %v100_v7 = vsub.f32 0.0, %v92_v3  ;;  %v608_v16 = vld [vmem:[#allocation5 + $0x8] sm:$0xff]  ;;  %v219_v17 = vsub.f32 1.0, %v83_v13  ;;  %v610_v18 = vld [vmem:[#allocation5 + $0x10] sm:$0xff]  ;;  %vm243_vm0 = vcmp.eq.f32.partialorder %v83_v13, 1.0 }
   0xf   :  { %v101_v12 = vsub.f32 0.0, %v93_v8  ;;  %v102_v14 = vsub.f32 0.0, %v94_v10  ;;  %v124_v21 = vsub.f32 0.0, %v599_v1  ;;  %v613_v22 = vld [vmem:[#allocation2 + $0x20] sm:$0xff]  ;;  %vm244_vm1 = vcmp.eq.f32.partialorder %v608_v16, 1.0  ;;  %v638_v42 = vld [vmem:[#allocation5 + $0x18] sm:$0xff] }
  0x10   :  { %v107_v9 = vmul.f32 1.442695, %v99_v5  ;;  %v109_v11 = vmul.f32 1.442695, %v100_v7  ;;  %v125_v23 = vsub.f32 0.0, %v602_v4  ;;  %vm245_vm2 = vcmp.eq.f32.partialorder %v610_v18, 1.0 }
  0x11   :  { %v111_v19 = vmul.f32 1.442695, %v101_v12  ;;  %v113_v20 = vmul.f32 1.442695, %v102_v14  ;;  %v126_v25 = vsub.f32 0.0, %v604_v6  ;;  %v131_v27 = vmax.f32 %v123_v15, 0.0 }
  0x12   :  { %449 = vpow2.f32 %v107_v9  ;;  %v619_v28 = vmul.f32 %v219_v17, %v75_v0  ;;  %v621_v29 = vsel %vm243_vm0, %v75_v0, 0.0  ;;  %v95_v30 = vand.u32 2147483647, %v613_v22  ;;  %v643_v48 = vld [vmem:[#allocation2 + $0x28] sm:$0xff]  ;;  %s428_s1 = sshll.u32 %s577_s0, 4  ;;  %s429_s1 = int_to_ptr.vmem [resolvable:$true] %s428_s1 }
  0x13   :  { %451 = vpow2.f32 %v109_v11  ;;  %v132_v34 = vmax.f32 %v124_v21, 0.0  ;;  %v627_v35 = vsel %vm244_vm1, %v599_v1, 0.0  ;;  %v629_v38 = vmax.f32 %v125_v23, 0.0 }
  0x14   :  { %453 = vpow2.f32 %v111_v19  ;;  %v634_v39 = vsel %vm245_vm2, %v602_v4, 0.0  ;;  %v320_v40 = vshrl.u32 %v319_v24, 7  ;;  %v636_v41 = vand.u32 127, %v319_v24 }
  0x15   :  { %455 = vpow2.f32 %v113_v20  ;;  %v640_v43 = vmax.f32 %v126_v25, 0.0  ;;  %v220_v46 = vsub.f32 1.0, %v608_v16  ;;  %v103_v47 = vsub.f32 0.0, %v95_v30 }
  0x16   :  { %vm246_vm3 = vcmp.eq.f32.partialorder %v638_v42, 1.0  ;;  %v646_v57 = vmul.u32 1024, %v320_v40  ;;  %v127_v58 = vsub.f32 0.0, %v613_v22  ;;  %v96_v59 = vand.u32 2147483647, %v643_v48 }
  0x17   :  { %v115_v5 = vmul.f32 1.442695, %v103_v47  ;;  %v659_v10 = vmul.f32 %v220_v46, %v599_v1  ;;  %v254_v13 = vsel %vm246_vm3, %v604_v6, 0.0  ;;  %v323_v16 = vadd.s32 128, %v636_v41 }
  0x18   :  { %v450_v26 = vpop.eup %449  ;;  %v104_v14 = vsub.f32 0.0, %v96_v59  ;;  %v222_v40 = vsub.f32 1.0, %v638_v42 }
  0x19   :  { %v452_v31 = vpop.eup %451  ;;  %v139_v32 = vadd.f32 1.0, %v450_v26  ;;  %v142_v33 = vmul.f32 -0.5, %v450_v26  ;;  %v145_v50 = vand.u32 2147483647, %v450_v26  ;;  %v698_v46 = vadd.s32 %v646_v57, %v323_v16 }
  0x1a   :  { %v148_v36 = vadd.f32 1.0, %v452_v31  ;;  %v151_v37 = vmul.f32 -0.5, %v452_v31  ;;  %v454_v44 = vpop.eup %453  ;;  %v154_v54 = vand.u32 2147483647, %v452_v31  ;;  %v117_v24 = vmul.f32 1.442695, %v104_v14 }
  0x1b   :  { %457 = vlog2.f32 %v139_v32  ;;  %v143_v45 = vadd.f32 1.0, %v142_v33  ;;  %v456_v49 = vpop.eup %455  ;;  %v157_v52 = vadd.f32 1.0, %v454_v44  ;;  %v160_v53 = vmul.f32 -0.5, %v454_v44 }
  0x1c   :  { %459 = vlog2.f32 %v148_v36  ;;  %v152_v51 = vadd.f32 1.0, %v151_v37  ;;  %v166_v55 = vadd.f32 1.0, %v456_v49  ;;  %v169_v56 = vmul.f32 -0.5, %v456_v49 }
  0x1d   :  { %461 = vlog2.f32 %v157_v52  ;;  %v144_v60 = vmul.f32 %v450_v26, %v143_v45  ;;  %v161_v61 = vadd.f32 1.0, %v160_v53  ;;  %v163_v62 = vand.u32 2147483647, %v454_v44 }
  0x1e   :  { %463 = vlog2.f32 %v166_v55  ;;  %vm650_vm4 = vcmp.lt.f32.partialorder %v145_v50, 0.0004427343  ;;  %v153_v2 = vmul.f32 %v452_v31, %v152_v51  ;;  %v170_v3 = vadd.f32 1.0, %v169_v56 }
  0x1f   :  { %vm654_vm5 = vcmp.lt.f32.partialorder %v154_v54, 0.0004427343  ;;  %v172_v11 = vand.u32 2147483647, %v456_v49  ;;  %465 = vpow2.f32 %v115_v5  ;;  %v162_v17 = vmul.f32 %v454_v44, %v161_v61  ;;  %v695_v44 = vld [vmem:[#allocation5 + $0x20] sm:$0xff]  ;;  %v715_v61 = vld [vmem:[#allocation5 + $0x28] sm:$0xff] }
  0x20   :  { %vm667_vm6 = vcmp.lt.f32.partialorder %v163_v62, 0.0004427343  ;;  %v171_v23 = vmul.f32 %v456_v49, %v170_v3  ;;  %v221_v31 = vsub.f32 1.0, %v610_v18  ;;  %v684_v36 = vmax.f32 %v127_v58, 0.0 }
  0x21   :  { %v458_v63 = vpop.eup %457  ;;  %vm678_vm7 = vcmp.lt.f32.partialorder %v172_v11, 0.0004427343  ;;  %467 = vpow2.f32 %v117_v24  ;;  %v688_v37 = vadd.s32 %v646_v57, %v636_v41  ;;  %vm247_vm8 = vcmp.eq.f32.partialorder %v695_v44, 1.0 }
  0x22   :  { %v460_v7 = vpop.eup %459  ;;  %v141_v8 = vmul.f32 0.6931472, %v458_v63  ;;  %v229_v53 = vmul.f32 %v221_v31, %v602_v4  ;;  %v230_v59 = vmul.f32 %v222_v40, %v604_v6  ;;  %v717_v63 = vld [vmem:[#allocation2 + $0x30] sm:$0xff]  ;;  %v128_v3 = vsub.f32 0.0, %v643_v48 }
  0x23   :  { %v150_v12 = vmul.f32 0.6931472, %v460_v7  ;;  %v462_v1 = vpop.eup %461  ;;  %vm339_vm9 = vcmp.lt.s32.totalorder %v688_v37, 2048  ;;  %vm340_vm10 = vcmp.lt.s32.totalorder %v698_v46, 2048  ;;  %vm248_vm11 = vcmp.eq.f32.partialorder %v715_v61, 1.0 }
  0x24   :  { %v147_v15 = vsel %vm650_vm4, %v144_v60, %v141_v8  ;;  %v464_v25 = vpop.eup %463  ;;  %v159_v30 = vmul.f32 0.6931472, %v462_v1  ;;  %v97_v11 = vand.u32 2147483647, %v717_v63  ;;  %v255_v14 = vsel %vm247_vm8, %v613_v22, 0.0 }
  0x25   :  { %v671_v20 = vadd.f32 %v147_v15, %v131_v27  ;;  %v156_v21 = vsel %vm654_vm5, %v153_v2, %v150_v12  ;;  %v168_v27 = vmul.f32 0.6931472, %v464_v25  ;;  %v466_v45 = vpop.eup %465  ;;  %v325_v2 = vadd.s32 384, %v636_v41 }
  0x26   :  { %v675_v26 = vadd.f32 %v156_v21, %v132_v34  ;;  %v165_v18 = vsel %vm667_vm6, %v162_v17, %v159_v30  ;;  %v175_v51 = vadd.f32 1.0, %v466_v45  ;;  %v178_v52 = vmul.f32 -0.5, %v466_v45 }
  0x27   :  { %v259_v33 = vadd.f32 %v621_v29, %v671_v20  ;;  %v701_v47 = vadd.f32 %v165_v18, %v629_v38  ;;  %v174_v49 = vsel %vm678_vm7, %v171_v23, %v168_v27  ;;  %v324_v38 = vadd.s32 256, %v636_v41  ;;  %v468_v58 = vpop.eup %467  ;;  %v736_v23 = vld [vmem:[#allocation2 + $0x38] sm:$0xff] }
  0x28   :  { %v260_v34 = vadd.f32 %v627_v35, %v675_v26  ;;  %v706_v35 = vadd.f32 %v174_v49, %v640_v43  ;;  %469 = vlog2.f32 %v175_v51  ;;  %v179_v60 = vadd.f32 1.0, %v178_v52 }
  0x29   :  { %v267_v29 = vsub.f32 0.0, %v259_v33  ;;  %v261_v54 = vadd.f32 %v634_v39, %v701_v47  ;;  %v181_v62 = vand.u32 2147483647, %v466_v45  ;;  %v184_v39 = vadd.f32 1.0, %v468_v58 }
  0x2a   :  { %v268_v50 = vsub.f32 0.0, %v260_v34  ;;  %v262_v56 = vadd.f32 %v254_v13, %v706_v35  ;;  %v187_v5 = vmul.f32 -0.5, %v468_v58  ;;  %v724_v6 = vadd.s32 %v646_v57, %v324_v38 }
  0x2b   :  { %v275_v42 = vmul.f32 1.442695, %v267_v29  ;;  %v269_v43 = vsub.f32 0.0, %v261_v54  ;;  %v180_v8 = vmul.f32 %v466_v45, %v179_v60  ;;  %vm728_vm12 = vcmp.lt.f32.partialorder %v181_v62, 0.0004427343 }
  0x2c   :  { %v277_v55 = vmul.f32 1.442695, %v268_v50  ;;  %v270_v4 = vsub.f32 0.0, %v262_v56  ;;  %v188_v9 = vadd.f32 1.0, %v187_v5  ;;  %v190_v15 = vand.u32 2147483647, %v468_v58 }
  0x2d   :  { %471 = vpow2.f32 %v275_v42  ;;  %v279_v0 = vmul.f32 1.442695, %v269_v43  ;;  %v334_v17 = vadd.s32 %v646_v57, %v325_v2  ;;  %v136_v1 = vmax.f32 %v128_v3, 0.0 }
  0x2e   :  { %473 = vpow2.f32 %v277_v55  ;;  %v281_v7 = vmul.f32 1.442695, %v270_v4  ;;  %v470_v12 = vpop.eup %469  ;;  %v105_v21 = vsub.f32 0.0, %v97_v11  ;;  %v235_v25 = vadd.f32 %v619_v28, %v671_v20 }
  0x2f   :  { %475 = vlog2.f32 %v184_v39  ;;  %v177_v19 = vmul.f32 0.6931472, %v470_v12  ;;  %v236_v31 = vadd.f32 %v659_v10, %v675_v26  ;;  %v256_v32 = vsel %vm248_vm11, %v643_v48, 0.0 }
  0x30   :  { %477 = vpow2.f32 %v279_v0  ;;  %v189_v34 = vmul.f32 %v468_v58, %v188_v9  ;;  %v119_v18 = vmul.f32 1.442695, %v105_v21  ;;  %vm748_vm13 = vcmp.lt.f32.partialorder %v190_v15, 0.0004427343 }
  0x31   :  { %479 = vpow2.f32 %v281_v7  ;;  %v183_v27 = vsel %vm728_vm12, %v180_v8, %v177_v19  ;;  %v98_v10 = vand.u32 2147483647, %v736_v23  ;;  %v237_v49 = vadd.f32 %v229_v53, %v701_v47 }
  0x32   :  { %v215_v29 = vadd.f32 %v183_v27, %v684_v36  ;;  %481 = vpow2.f32 %v119_v18  ;;  %v238_v54 = vadd.f32 %v230_v59, %v706_v35  ;;  %vm341_vm14 = vcmp.lt.s32.totalorder %v724_v6, 2048 }
  0x33   :  { %v472_v16 = vpop.eup %471  ;;  %v106_v58 = vsub.f32 0.0, %v98_v10  ;;  %vm342_vm15 = vcmp.lt.s32.totalorder %v334_v17, 2048  ;;  %v223_v2 = vsub.f32 1.0, %v695_v44  ;;  %v326_v6 = vadd.s32 512, %v636_v41 }
  0x34   :  { %v474_v24 = vpop.eup %473  ;;  %v291_v30 = vmul.f32 %v472_v16, %v472_v16  ;;  %v263_v55 = vadd.f32 %v255_v14, %v215_v29  ;;  %v224_v44 = vsub.f32 1.0, %v715_v61  ;;  %v129_v14 = vsub.f32 0.0, %v717_v63  ;;  %v89_v16 = vld [vmem:[#allocation5 + $0x30] sm:$0xff] }
  0x35   :  { %v292_v33 = vmul.f32 %v474_v24, %v474_v24  ;;  %v476_v40 = vpop.eup %475  ;;  %v121_v37 = vmul.f32 1.442695, %v106_v58  ;;  %v231_v11 = vmul.f32 %v223_v2, %v613_v22  ;;  %v335_v19 = vadd.s32 %v646_v57, %v326_v6 }
  0x36   :  { %v299_v45 = vmul.f32 0.25, %v291_v30  ;;  %v478_v20 = vpop.eup %477  ;;  %v186_v50 = vmul.f32 0.6931472, %v476_v40  ;;  %v271_v4 = vsub.f32 0.0, %v263_v55  ;;  %v327_v24 = vadd.s32 640, %v636_v41 }
  0x37   :  { %v300_v26 = vmul.f32 0.25, %v292_v33  ;;  %v480_v51 = vpop.eup %479  ;;  %v293_v42 = vmul.f32 %v478_v20, %v478_v20  ;;  %v232_v30 = vmul.f32 %v224_v44, %v643_v48  ;;  %vm249_vm1 = vcmp.eq.f32.partialorder %v89_v16, 1.0 }
  0x38   :  { %v307_v52 = vmul.f32 %v299_v45, %v235_v25  ;;  %v294_v36 = vmul.f32 %v480_v51, %v480_v51  ;;  %v192_v56 = vsel %vm748_vm13, %v189_v34, %v186_v50  ;;  %v283_v59 = vmul.f32 1.442695, %v271_v4  ;;  %v482_v39 = vpop.eup %481 }
  0x39   :  { %v308_v38 = vmul.f32 %v300_v26, %v236_v31  ;;  %v301_v60 = vmul.f32 0.25, %v293_v42  ;;  %v216_v47 = vadd.f32 %v192_v56, %v136_v1  ;;  %v193_v7 = vadd.f32 1.0, %v482_v39  ;;  %v90_v42 = vld [vmem:[#allocation5 + $0x38] sm:$0xff] }
  0x3a   :  { %v347_v43 = vsel %vm339_vm9, %v307_v52, 0.0  ;;  %v302_v62 = vmul.f32 0.25, %v294_v36  ;;  %483 = vpow2.f32 %v283_v59  ;;  %v196_v8 = vmul.f32 -0.5, %v482_v39 }
  0x3b   :  { %v348_v53 = vsel %vm340_vm10, %v308_v38, 0.0  ;;  %v309_v35 = vmul.f32 %v301_v60, %v237_v49  ;;  %379 = vst [vmem:[#allocation7] sm:$0xff] %v347_v43  ;;  %v264_v3 = vadd.f32 %v256_v32, %v216_v47  ;;  %485 = vlog2.f32 %v193_v7 }
  0x3c   :  { %v310_v0 = vmul.f32 %v302_v62, %v238_v54  ;;  %380 = vst [vmem:[#allocation7 + $0x8] sm:$0xff] %v348_v53  ;;  %v197_v13 = vadd.f32 1.0, %v196_v8  ;;  %487 = vpow2.f32 %v121_v37  ;;  %v199_v15 = vand.u32 2147483647, %v482_v39 }
  0x3d   :  { %v349_v5 = vsel %vm341_vm14, %v309_v35, 0.0  ;;  %v272_v9 = vsub.f32 0.0, %v264_v3  ;;  %v239_v1 = vadd.f32 %v231_v11, %v215_v29  ;;  %v137_v31 = vmax.f32 %v129_v14, 0.0 }
  0x3e   :  { %v350_v46 = vsel %vm342_vm15, %v310_v0, 0.0  ;;  %381 = vst [vmem:[#allocation7 + $0x10] sm:$0xff] %v349_v5  ;;  %v198_v25 = vmul.f32 %v482_v39, %v197_v13  ;;  %vm200_vm0 = vcmp.lt.f32.partialorder %v199_v15, 0.0004427343  ;;  %vm343_vm2 = vcmp.lt.s32.totalorder %v335_v19, 2048 }
  0x3f   :  { %v285_v12 = vmul.f32 1.442695, %v272_v9  ;;  %382 = vst [vmem:[#allocation7 + $0x18] sm:$0xff] %v350_v46  ;;  %v336_v45 = vadd.s32 %v646_v57, %v327_v24  ;;  %v257_v28 = vsel %vm249_vm1, %v717_v63, 0.0  ;;  %v240_v10 = vadd.f32 %v232_v30, %v216_v47 }
  0x40   :  { %v484_v17 = vpop.eup %483  ;;  %v130_v49 = vsub.f32 0.0, %v736_v23  ;;  %vm250_vm4 = vcmp.eq.f32.partialorder %v90_v42, 1.0  ;;  %v225_v4 = vsub.f32 1.0, %v89_v16  ;;  %v328_v35 = vadd.s32 768, %v636_v41 }
  0x41   :  { %489 = vpow2.f32 %v285_v12  ;;  %v295_v21 = vmul.f32 %v484_v17, %v484_v17  ;;  %v486_v22 = vpop.eup %485  ;;  %vm344_vm3 = vcmp.lt.s32.totalorder %v336_v45, 2048  ;;  %v258_v62 = vsel %vm250_vm4, %v736_v23, 0.0 }
  0x42   :  { %v488_v61 = vpop.eup %487  ;;  %v195_v33 = vmul.f32 0.6931472, %v486_v22  ;;  %v138_v60 = vmax.f32 %v130_v49, 0.0  ;;  %v233_v39 = vmul.f32 %v225_v4, %v717_v63  ;;  %v337_v3 = vadd.s32 %v646_v57, %v328_v35 }
  0x43   :  { %v303_v32 = vmul.f32 0.25, %v295_v21  ;;  %v202_v27 = vadd.f32 1.0, %v488_v61  ;;  %v205_v34 = vmul.f32 -0.5, %v488_v61  ;;  %v208_v54 = vand.u32 2147483647, %v488_v61 }
  0x44   :  { %v201_v29 = vsel %vm200_vm0, %v198_v25, %v195_v33  ;;  %v226_v9 = vsub.f32 1.0, %v90_v42  ;;  %vm345_vm6 = vcmp.lt.s32.totalorder %v337_v3, 2048  ;;  %v329_v11 = vadd.s32 896, %v636_v41 }
  0x45   :  { %v311_v40 = vmul.f32 %v303_v32, %v239_v1  ;;  %v217_v26 = vadd.f32 %v201_v29, %v137_v31  ;;  %491 = vlog2.f32 %v202_v27  ;;  %v206_v50 = vadd.f32 1.0, %v205_v34 }
  0x46   :  { %vm209_vm5 = vcmp.lt.f32.partialorder %v208_v54, 0.0004427343  ;;  %v234_v13 = vmul.f32 %v226_v9, %v736_v23  ;;  %v338_v63 = vadd.s32 %v646_v57, %v329_v11 }
  0x47   :  { %v490_v18 = vpop.eup %489  ;;  %v351_v48 = vsel %vm343_vm2, %v311_v40, 0.0  ;;  %v265_v52 = vadd.f32 %v257_v28, %v217_v26  ;;  %v207_v36 = vmul.f32 %v488_v61, %v206_v50  ;;  %v241_v5 = vadd.f32 %v233_v39, %v217_v26 }
  0x48   :  { %v296_v20 = vmul.f32 %v490_v18, %v490_v18  ;;  %383 = vst [vmem:[#allocation7 + $0x20] sm:$0xff] %v351_v48  ;;  %vm346_vm7 = vcmp.lt.s32.totalorder %v338_v63, 2048 }
  0x49   :  { %v273_v38 = vsub.f32 0.0, %v265_v52 }
  0x4a   :  { %v304_v51 = vmul.f32 0.25, %v296_v20 }
  0x4b   :  { %v492_v56 = vpop.eup %491  ;;  %v287_v43 = vmul.f32 1.442695, %v273_v38 }
  0x4c   :  { %v312_v55 = vmul.f32 %v304_v51, %v240_v10  ;;  %v204_v47 = vmul.f32 0.6931472, %v492_v56 }
  0x4d   :  { %493 = vpow2.f32 %v287_v43 }
  0x4e   :  { %v352_v58 = vsel %vm344_vm3, %v312_v55, 0.0  ;;  %v210_v53 = vsel %vm209_vm5, %v207_v36, %v204_v47 }
  0x4f   :  { %384 = vst [vmem:[#allocation7 + $0x28] sm:$0xff] %v352_v58  ;;  %v218_v59 = vadd.f32 %v210_v53, %v138_v60 }
  0x51   :  { %v266_v0 = vadd.f32 %v258_v62, %v218_v59  ;;  %v242_v14 = vadd.f32 %v234_v13, %v218_v59 }
  0x53   :  { %v494_v2 = vpop.eup %493  ;;  %v274_v37 = vsub.f32 0.0, %v266_v0 }
  0x54   :  { %v297_v7 = vmul.f32 %v494_v2, %v494_v2 }
  0x55   :  { %v289_v8 = vmul.f32 1.442695, %v274_v37 }
  0x56   :  { %v305_v46 = vmul.f32 0.25, %v297_v7 }
  0x57   :  { %495 = vpow2.f32 %v289_v8 }
  0x58   :  { %v313_v6 = vmul.f32 %v305_v46, %v241_v5 }
  0x5a   :  { %v353_v12 = vsel %vm345_vm6, %v313_v6, 0.0 }
  0x5b   :  { %385 = vst [vmem:[#allocation7 + $0x30] sm:$0xff] %v353_v12 }
  0x5d   :  { %v496_v44 = vpop.eup %495 }
  0x5e   :  { %v298_v15 = vmul.f32 %v496_v44, %v496_v44 }
  0x60   :  { %v306_v16 = vmul.f32 0.25, %v298_v15 }
  0x62   :  { %v314_v17 = vmul.f32 %v306_v16, %v242_v14 }
  0x64   :  { %v354_v19 = vsel %vm346_vm7, %v314_v17, 0.0 }
  0x65   :  { %386 = vst [vmem:[#allocation7 + $0x38] sm:$0xff] %v354_v19 }
  0x66   :  { %433 = dma.vmem_to_hbm [thread:$0]  %s429_s1, 1024, %s431_s21, [#allocation4]  }
  0x67   :  { %573 = dma.done.wait [#allocation4], 1024  }
  0x68   :  { %574 = vsyncadd [#allocation4], 4294966272 }
  0x69   :  { %438 = vsyncpa [#allocation3], 1 }
  0x6a   :  { %439 = vsyncpa [#allocation6], 1 }
  0x6b   :  { %440 = vsyncpa [#allocation4], 1 }

</bundles_post_ra>
